<compile_context>
chip_gen: v7x
topology: tpu7x:2x2x1
jax: 0.10.0
libtpu: 0.0.40
codegen_flags: <defaults>
</compile_context>

<pallas_src>
import functools
import math

import jax
import jax.numpy as jnp
from jax.experimental import pallas as pl
from jax.experimental.pallas import tpu as pltpu

HIDDEN = 256
LANE = 128          # lane width (last-dim tile)
SUBLANE_TILE = 16   # batch-tile granularity (bf16 sublane packing)


def _round_up(x, m):
    return ((x + m - 1) // m) * m


def actor_kernel(x_ref, w1_ref, b1_ref, w2_ref, b2_ref, w3_ref, b3_ref, o_ref,
                 *, upper_bound):
    # Matmul operands in bf16 (MXU), accumulate + epilogue in f32.
    x = x_ref[...].astype(jnp.bfloat16)                                   # (TB, S_pad)
    h1 = jnp.dot(x, w1_ref[...], preferred_element_type=jnp.float32) + b1_ref[...]
    h1 = jnp.maximum(h1, 0.0)                                             # (TB, 256) f32
    h2 = jnp.dot(h1.astype(jnp.bfloat16), w2_ref[...],
                 preferred_element_type=jnp.float32) + b2_ref[...]
    h2 = jnp.maximum(h2, 0.0)                                             # (TB, 256) f32
    h3 = jnp.dot(h2.astype(jnp.bfloat16), w3_ref[...],
                 preferred_element_type=jnp.float32) + b3_ref[...]        # (TB, A_pad)
    o_ref[...] = (jnp.tanh(h3) * upper_bound).astype(o_ref.dtype)


def init_actor_params(key, statedim, actiondim, hidden=HIDDEN):
    """nn.Linear-style init (uniform(-1/sqrt(fan_in), 1/sqrt(fan_in))).

    Weights stored (in, out) in bf16 for the MXU; biases (1, out) f32.
    Layer-1 rows are padded to a 128 multiple and layer-3 columns are padded
    to a 128 multiple ONCE here (not per forward call).
    """
    k1, k2, k3 = jax.random.split(key, 3)

    def linear(k, fan_in, fan_out):
        kw, kb = jax.random.split(k)
        bound = 1.0 / math.sqrt(fan_in)
        w = jax.random.uniform(kw, (fan_in, fan_out), jnp.float32, -bound, bound)
        b = jax.random.uniform(kb, (1, fan_out), jnp.float32, -bound, bound)
        return w, b

    w1, b1 = linear(k1, statedim, hidden)
    w2, b2 = linear(k2, hidden, hidden)
    w3, b3 = linear(k3, hidden, actiondim)

    s_pad = max(LANE, _round_up(statedim, LANE))
    a_pad = max(LANE, _round_up(actiondim, LANE))
    w1p = jnp.zeros((s_pad, hidden), jnp.float32).at[:statedim, :].set(w1)
    w3p = jnp.zeros((hidden, a_pad), jnp.float32).at[:, :actiondim].set(w3)
    b3p = jnp.zeros((1, a_pad), jnp.float32).at[:, :actiondim].set(b3)

    return dict(
        w1=w1p.astype(jnp.bfloat16), b1=b1,
        w2=w2.astype(jnp.bfloat16), b2=b2,
        w3=w3p.astype(jnp.bfloat16), b3=b3p,
        statedim=statedim, actiondim=actiondim,
    )


def actor_forward(state, params, upper_bound, *, batch_tile=256):
    """state: (B, statedim) f32.  params from init_actor_params (pre-padded)."""
    w1, b1 = params["w1"], params["b1"]
    w2, b2 = params["w2"], params["b2"]
    w3, b3 = params["w3"], params["b3"]
    statedim, actiondim = params["statedim"], params["actiondim"]

    B, S = state.shape
    assert S == statedim
    S_pad = w1.shape[0]
    A_pad = w3.shape[1]

    # Batch tile: multiple of 16 sublanes; when B allows, pick TB so the grid
    # has >= 2 steps and dimension_semantics=("parallel",) can shard the batch
    # axis across v7x's two TensorCores (no-op on single-TC v5e/v6e).
    if B <= SUBLANE_TILE:
        TB = SUBLANE_TILE
    else:
        TB = min(batch_tile, _round_up(pl.cdiv(B, 2), SUBLANE_TILE))
    grid_b = pl.cdiv(B, TB)
    B_pad = grid_b * TB

    # At most one host-side pad; skipped entirely in the steady-state case
    # (B % TB == 0 and statedim a multiple of 128).
    if B_pad != B or S_pad != S:
        state = jnp.pad(state, ((0, B_pad - B), (0, S_pad - S)))

    itemsize = lambda a: a.size * a.dtype.itemsize
    flops = 2 * B_pad * (S_pad * HIDDEN + HIDDEN * HIDDEN + HIDDEN * A_pad)
    bytes_accessed = (B_pad * S_pad * 4 + itemsize(w1) + itemsize(b1)
                      + itemsize(w2) + itemsize(b2) + itemsize(w3) + itemsize(b3)
                      + B_pad * A_pad * 4)
    cost = pl.CostEstimate(flops=int(flops),
                           transcendentals=int(B_pad * A_pad),
                           bytes_accessed=int(bytes_accessed))

    out = pl.pallas_call(
        functools.partial(actor_kernel, upper_bound=float(upper_bound)),
        out_shape=jax.ShapeDtypeStruct((B_pad, A_pad), jnp.float32),
        grid=(grid_b,),
        in_specs=[
            pl.BlockSpec((TB, S_pad), lambda i: (i, 0)),   # state: one batch tile / step
            pl.BlockSpec(w1.shape, lambda i: (0, 0)),      # weights/biases: VMEM-resident
            pl.BlockSpec(b1.shape, lambda i: (0, 0)),
            pl.BlockSpec(w2.shape, lambda i: (0, 0)),
            pl.BlockSpec(b2.shape, lambda i: (0, 0)),
            pl.BlockSpec(w3.shape, lambda i: (0, 0)),
            pl.BlockSpec(b3.shape, lambda i: (0, 0)),
        ],
        out_specs=pl.BlockSpec((TB, A_pad), lambda i: (i, 0)),
        compiler_params=pltpu.CompilerParams(
            dimension_semantics=("parallel",)),
        cost_estimate=cost,
    )(state, w1, b1, w2, b2, w3, b3)

    # Slice off batch / action padding (callers that can consume the padded
    # lane-dense slab directly should skip this to save an HBM pass).
    return out[:B, :actiondim]


def reference_forward(state, params, upper_bound):
    # Pure-JAX reference with identical bf16-weight / f32-accumulate semantics.
    S = params["statedim"]
    A = params["actiondim"]
    h1 = jnp.dot(state.astype(jnp.bfloat16), params["w1"][:S],
                 preferred_element_type=jnp.float32) + params["b1"]
    h1 = jnp.maximum(h1, 0.0)
    h2 = jnp.dot(h1.astype(jnp.bfloat16), params["w2"],
                 preferred_element_type=jnp.float32) + params["b2"]
    h2 = jnp.maximum(h2, 0.0)
    h3 = jnp.dot(h2.astype(jnp.bfloat16), params["w3"],
                 preferred_element_type=jnp.float32) + params["b3"]
    return (jnp.tanh(h3) * upper_bound)[:, :A]


if __name__ == "__main__":
    statedim, actiondim = 8, 4
    batch = 2
    upper_bound = 5.0

    key = jax.random.PRNGKey(0)
    k_state, k_params = jax.random.split(key)

    state = jax.random.normal(k_state, (batch, statedim), jnp.float32)
    params = init_actor_params(k_params, statedim, actiondim)

    out = actor_forward(state, params, upper_bound)
    out = jax.block_until_ready(out)

    ref = reference_forward(state, params, upper_bound)
    assert out.shape == (batch, actiondim)
    assert jnp.allclose(out, ref, atol=1e-3, rtol=1e-3), "mismatch vs reference"

    print("KERNEL_OK")
</pallas_src>

<mosaic_0001>
module attributes {stable_mosaic.version = 11 : i64} {
  func.func @actor_kernel(%arg0: i32, %arg1: memref<16x128xf32, #tpu.memory_space<vmem>>, %arg2: memref<128x256xbf16, #tpu.memory_space<vmem>>, %arg3: memref<1x256xf32, #tpu.memory_space<vmem>>, %arg4: memref<256x256xbf16, #tpu.memory_space<vmem>>, %arg5: memref<1x256xf32, #tpu.memory_space<vmem>>, %arg6: memref<256x128xbf16, #tpu.memory_space<vmem>>, %arg7: memref<1x128xf32, #tpu.memory_space<vmem>>, %arg8: memref<16x128xf32, #tpu.memory_space<vmem>>) attributes {dimension_semantics = [#tpu.dimension_semantics<parallel>], iteration_bounds = array<i64: 1>, scalar_prefetch = 0 : i64, scratch_operands = 0 : i64, tpu.core_type = #tpu.core_type<tc>, window_params = [{transform_indices = @transform_0, window_bounds = array<i64: 16, 128>}, {pipeline_mode = #tpu.pipeline_mode<synchronous>, transform_indices = @transform_1, window_bounds = array<i64: 128, 256>}, {pipeline_mode = #tpu.pipeline_mode<synchronous>, transform_indices = @transform_2, window_bounds = array<i64: 1, 256>}, {pipeline_mode = #tpu.pipeline_mode<synchronous>, transform_indices = @transform_3, window_bounds = array<i64: 256, 256>}, {pipeline_mode = #tpu.pipeline_mode<synchronous>, transform_indices = @transform_4, window_bounds = array<i64: 1, 256>}, {pipeline_mode = #tpu.pipeline_mode<synchronous>, transform_indices = @transform_5, window_bounds = array<i64: 256, 128>}, {pipeline_mode = #tpu.pipeline_mode<synchronous>, transform_indices = @transform_6, window_bounds = array<i64: 1, 128>}, {transform_indices = @transform_7, window_bounds = array<i64: 16, 128>}]} {
    %c0 = arith.constant 0 : index
    %c0_0 = arith.constant 0 : index
    %0 = vector.load %arg1[%c0, %c0_0] : memref<16x128xf32, #tpu.memory_space<vmem>>, vector<16x128xf32>
    %1 = arith.truncf %0 : vector<16x128xf32> to vector<16x128xbf16>
    %c0_1 = arith.constant 0 : index
    %c0_2 = arith.constant 0 : index
    %2 = vector.load %arg2[%c0_1, %c0_2] : memref<128x256xbf16, #tpu.memory_space<vmem>>, vector<128x256xbf16>
    %cst = arith.constant dense<0.000000e+00> : vector<16x256xf32>
    %3 = tpu.matmul %1, %2, %cst {dimension_numbers = #tpu.dot_dimension_numbers<[1], [0], [0], [1], [0, 0, 1, 1], [], []>} : vector<16x128xbf16>, vector<128x256xbf16>, vector<16x256xf32> -> vector<16x256xf32>
    %c0_3 = arith.constant 0 : index
    %c0_4 = arith.constant 0 : index
    %4 = vector.load %arg3[%c0_3, %c0_4] : memref<1x256xf32, #tpu.memory_space<vmem>>, vector<1x256xf32>
    %5 = vector.broadcast %4 : vector<1x256xf32> to vector<16x256xf32>
    %6 = arith.addf %3, %5 : vector<16x256xf32>
    %cst_5 = arith.constant 0.000000e+00 : f32
    %7 = vector.broadcast %cst_5 : f32 to vector<16x256xf32>
    %8 = arith.maximumf %6, %7 : vector<16x256xf32>
    %9 = arith.truncf %8 : vector<16x256xf32> to vector<16x256xbf16>
    %c0_6 = arith.constant 0 : index
    %c0_7 = arith.constant 0 : index
    %10 = vector.load %arg4[%c0_6, %c0_7] : memref<256x256xbf16, #tpu.memory_space<vmem>>, vector<256x256xbf16>
    %cst_8 = arith.constant dense<0.000000e+00> : vector<16x256xf32>
    %11 = tpu.matmul %9, %10, %cst_8 {dimension_numbers = #tpu.dot_dimension_numbers<[1], [0], [0], [1], [0, 0, 1, 1], [], []>} : vector<16x256xbf16>, vector<256x256xbf16>, vector<16x256xf32> -> vector<16x256xf32>
    %c0_9 = arith.constant 0 : index
    %c0_10 = arith.constant 0 : index
    %12 = vector.load %arg5[%c0_9, %c0_10] : memref<1x256xf32, #tpu.memory_space<vmem>>, vector<1x256xf32>
    %13 = vector.broadcast %12 : vector<1x256xf32> to vector<16x256xf32>
    %14 = arith.addf %11, %13 : vector<16x256xf32>
    %cst_11 = arith.constant 0.000000e+00 : f32
    %15 = vector.broadcast %cst_11 : f32 to vector<16x256xf32>
    %16 = arith.maximumf %14, %15 : vector<16x256xf32>
    %17 = arith.truncf %16 : vector<16x256xf32> to vector<16x256xbf16>
    %c0_12 = arith.constant 0 : index
    %c0_13 = arith.constant 0 : index
    %18 = vector.load %arg6[%c0_12, %c0_13] : memref<256x128xbf16, #tpu.memory_space<vmem>>, vector<256x128xbf16>
    %cst_14 = arith.constant dense<0.000000e+00> : vector<16x128xf32>
    %19 = tpu.matmul %17, %18, %cst_14 {dimension_numbers = #tpu.dot_dimension_numbers<[1], [0], [0], [1], [0, 0, 1, 1], [], []>} : vector<16x256xbf16>, vector<256x128xbf16>, vector<16x128xf32> -> vector<16x128xf32>
    %c0_15 = arith.constant 0 : index
    %c0_16 = arith.constant 0 : index
    %20 = vector.load %arg7[%c0_15, %c0_16] : memref<1x128xf32, #tpu.memory_space<vmem>>, vector<1x128xf32>
    %21 = vector.broadcast %20 : vector<1x128xf32> to vector<16x128xf32>
    %22 = arith.addf %19, %21 : vector<16x128xf32>
    %23 = math.tanh %22 : vector<16x128xf32>
    %cst_17 = arith.constant 5.000000e+00 : f32
    %24 = vector.broadcast %cst_17 : f32 to vector<16x128xf32>
    %25 = arith.mulf %23, %24 : vector<16x128xf32>
    %c0_18 = arith.constant 0 : index
    %c0_19 = arith.constant 0 : index
    %26 = vector.load %arg8[%c0_18, %c0_19] : memref<16x128xf32, #tpu.memory_space<vmem>>, vector<16x128xf32>
    tpu.vector_store %arg8[%c0_18, %c0_19], %25 {strides = array<i32>} : memref<16x128xf32, #tpu.memory_space<vmem>>, vector<16x128xf32>,
    return
  }
  func.func @transform_0(%arg0: i32) -> (i32, i32) {
    %c0_i32 = arith.constant 0 : i32
    %c0_i32_0 = arith.constant 0 : i32
    return %arg0, %c0_i32 : i32, i32
  }
  func.func @transform_1(%arg0: i32) -> (i32, i32) {
    %c0_i32 = arith.constant 0 : i32
    %c0_i32_0 = arith.constant 0 : i32
    %c0_i32_1 = arith.constant 0 : i32
    return %c0_i32, %c0_i32_0 : i32, i32
  }
  func.func @transform_2(%arg0: i32) -> (i32, i32) {
    %c0_i32 = arith.constant 0 : i32
    %c0_i32_0 = arith.constant 0 : i32
    %c0_i32_1 = arith.constant 0 : i32
    return %c0_i32, %c0_i32_0 : i32, i32
  }
  func.func @transform_3(%arg0: i32) -> (i32, i32) {
    %c0_i32 = arith.constant 0 : i32
    %c0_i32_0 = arith.constant 0 : i32
    %c0_i32_1 = arith.constant 0 : i32
    return %c0_i32, %c0_i32_0 : i32, i32
  }
  func.func @transform_4(%arg0: i32) -> (i32, i32) {
    %c0_i32 = arith.constant 0 : i32
    %c0_i32_0 = arith.constant 0 : i32
    %c0_i32_1 = arith.constant 0 : i32
    return %c0_i32, %c0_i32_0 : i32, i32
  }
  func.func @transform_5(%arg0: i32) -> (i32, i32) {
    %c0_i32 = arith.constant 0 : i32
    %c0_i32_0 = arith.constant 0 : i32
    %c0_i32_1 = arith.constant 0 : i32
    return %c0_i32, %c0_i32_0 : i32, i32
  }
  func.func @transform_6(%arg0: i32) -> (i32, i32) {
    %c0_i32 = arith.constant 0 : i32
    %c0_i32_0 = arith.constant 0 : i32
    %c0_i32_1 = arith.constant 0 : i32
    return %c0_i32, %c0_i32_0 : i32, i32
  }
  func.func @transform_7(%arg0: i32) -> (i32, i32) {
    %c0_i32 = arith.constant 0 : i32
    %c0_i32_0 = arith.constant 0 : i32
    return %arg0, %c0_i32 : i32, i32
  }
}

</mosaic_0001>

<bundles_post_ra>
// kernel: tpu_custom_call.1
= control target key start
LH: loop header
LB: loop body
LE: loop exit
PB: predicated region body
PF: predicated region fallthrough
CT: control target
= control target key end

     0   :  { %12 = vsyncpa [#allocation3], 0  ;;  %s1149_s0 = inlined_call_operand.hbm [shape: f32[16,128], index: 0, kind: input, shape index: {}]   ;;  %s1150_s1 = inlined_call_operand.hbm [shape: bf16[128,256], index: 1, kind: input, shape index: {}]   ;;  %s1151_s2 = inlined_call_operand.vmem [shape: f32[1,256], index: 2, kind: input, shape index: {}]   ;;  %s1152_s3 = inlined_call_operand.hbm [shape: bf16[256,256], index: 3, kind: input, shape index: {}]   ;;  %s1153_s4 = inlined_call_operand.vmem [shape: f32[1,256], index: 4, kind: input, shape index: {}]   ;;  %s1154_s5 = inlined_call_operand.hbm [shape: bf16[256,128], index: 5, kind: input, shape index: {}]   ;;  %s1155_s6 = inlined_call_operand.vmem [shape: f32[1,128], index: 6, kind: input, shape index: {}]   ;;  %s1156_s7 = inlined_call_operand.hbm [shape: f32[16,128], index: 7, kind: output, shape index: {}]  }
   0x1   :  { %13 = vsyncpa [#allocation6], 0 }
   0x2   :  { %14 = vsyncpa [#allocation9], 0 }
   0x3   :  { %15 = vsyncpa [#allocation4], 0  ;;  %s1004_s24 = smov [#allocation5]   ;;  %s1005_s26 = smov [#allocation2]  }
   0x4   :  { %s33_s25 = sshll.u32 %s1004_s24, 4  ;;  %s21_s27 = sshll.u32 %s1005_s26, 4  ;;  %s34_s25 = int_to_ptr.vmem [resolvable:$true] %s33_s25  ;;  %s1054_s27 = int_to_ptr.vmem [resolvable:$true] %s21_s27 }
   0x5   :  { %s886_s30 = scalar_lea.hbm %s1150_s1, 2048 }
   0x6   :  { %p887_p0 = scmp.ne.s32.totalorder %s1150_s1, %s886_s30  ;;  %p890_p1 = scmp.lt.u32.totalorder %s886_s30, %s1150_s1 }
   0x8   :  { %p892_p2 = pnand %p890_p1, %p887_p0 }
   0xa   :  { %895 = shalt.err (!%p892_p2)
}
   0xb   :  { %s896_s12 = scalar_lea.vmem %s34_s25, 2048  ;;  %p901_p4 = scmp.lt.s32.totalorder %s34_s25, %s34_s25 }
   0xc   :  { %p897_p3 = scmp.ne.s32.totalorder %s34_s25, %s896_s12  ;;  %p902_p5 = scmp.lt.s32.totalorder %s896_s12, %s896_s12 }
   0xe   :  { %p903_p6 = por %p902_p5, %p901_p4 }
  0x10   :  { %p904_p7 = pnand %p903_p6, %p897_p3 }
  0x12   :  { %907 = shalt.err (!%p904_p7)
}
  0x13   :  { %s1006_s13 = smov 128   ;;  %s1007_s14 = smov 8  }
  0x14   :  { %39 = dma.hbm_to_vmem [thread:$0]  %s1150_s1, 2048, %s34_s25, [#allocation6], %s1006_s13, %s1006_s13, %s1007_s14  }
  0x15   :  { %s908_s19 = scalar_lea.hbm %s1149_s0, 256 }
  0x16   :  { %p909_p8 = scmp.ne.s32.totalorder %s1149_s0, %s908_s19  ;;  %p912_p9 = scmp.lt.u32.totalorder %s908_s19, %s1149_s0 }
  0x18   :  { %p914_p10 = pnand %p912_p9, %p909_p8 }
  0x1a   :  { %917 = shalt.err (!%p914_p10)
}
  0x1b   :  { %s918_s24 = scalar_lea.vmem %s1054_s27, 256  ;;  %p923_p12 = scmp.lt.s32.totalorder %s1054_s27, %s1054_s27 }
  0x1c   :  { %p919_p11 = scmp.ne.s32.totalorder %s1054_s27, %s918_s24  ;;  %p924_p13 = scmp.lt.s32.totalorder %s918_s24, %s918_s24 }
  0x1e   :  { %p925_p0 = por %p924_p13, %p923_p12 }
  0x20   :  { %p926_p1 = pnand %p925_p0, %p919_p11 }
  0x22   :  { %929 = shalt.err (!%p926_p1)
}
  0x23   :  { %27 = dma.hbm_to_vmem [thread:$0]  %s1149_s0, 256, %s1054_s27, [#allocation3], %s1006_s13, %s1006_s13, %s1007_s14  }
  0x24   :  { %s1008_s26 = smov [#allocation7]   ;;  %s1009_s29 = smov [#allocation8]  }
  0x25   :  { %s47_s28 = sshll.u32 %s1008_s26, 4  ;;  %s61_s30 = sshll.u32 %s1009_s29, 4  ;;  %s48_s28 = int_to_ptr.vmem [resolvable:$true] %s47_s28  ;;  %s1091_s30 = int_to_ptr.vmem [resolvable:$true] %s61_s30 }
  0x26   :  { %s930_s10 = scalar_lea.hbm %s1152_s3, 4096 }
  0x27   :  { %p931_p2 = scmp.ne.s32.totalorder %s1152_s3, %s930_s10  ;;  %p934_p3 = scmp.lt.u32.totalorder %s930_s10, %s1152_s3 }
  0x29   :  { %p936_p4 = pnand %p934_p3, %p931_p2 }
  0x2b   :  { %939 = shalt.err (!%p936_p4)
}
  0x2c   :  { %s940_s0 = scalar_lea.vmem %s48_s28, 4096  ;;  %p945_p6 = scmp.lt.s32.totalorder %s48_s28, %s48_s28 }
  0x2d   :  { %p941_p5 = scmp.ne.s32.totalorder %s48_s28, %s940_s0  ;;  %p946_p7 = scmp.lt.s32.totalorder %s940_s0, %s940_s0 }
  0x2f   :  { %p947_p8 = por %p946_p7, %p945_p6 }
  0x31   :  { %p948_p9 = pnand %p947_p8, %p941_p5 }
  0x33   :  { %951 = shalt.err (!%p948_p9)
}
  0x34   :  { %53 = dma.hbm_to_vmem [thread:$0]  %s1152_s3, 4096, %s48_s28, [#allocation6], %s1006_s13, %s1006_s13, %s1007_s14  }
  0x35   :  { %s952_s20 = scalar_lea.hbm %s1154_s5, 2048 }
  0x36   :  { %p953_p10 = scmp.ne.s32.totalorder %s1154_s5, %s952_s20  ;;  %p956_p11 = scmp.lt.u32.totalorder %s952_s20, %s1154_s5 }
  0x38   :  { %p958_p12 = pnand %p956_p11, %p953_p10 }
  0x3a   :  { %961 = shalt.err (!%p958_p12)
}
  0x3b   :  { %s962_s1 = scalar_lea.vmem %s1091_s30, 2048  ;;  %p967_p0 = scmp.lt.s32.totalorder %s1091_s30, %s1091_s30 }
  0x3c   :  { %p963_p13 = scmp.ne.s32.totalorder %s1091_s30, %s962_s1  ;;  %p968_p1 = scmp.lt.s32.totalorder %s962_s1, %s962_s1 }
  0x3e   :  { %p969_p2 = por %p968_p1, %p967_p0 }
  0x40   :  { %p970_p3 = pnand %p969_p2, %p963_p13 }
  0x42   :  { %973 = shalt.err (!%p970_p3)
}
  0x43   :  { %s1010_s3 = smov 64   ;;  %s1011_s25 = smov 4  }
  0x44   :  { %67 = dma.hbm_to_vmem [thread:$0]  %s1154_s5, 2048, %s1091_s30, [#allocation9], %s1010_s3, %s1010_s3, %s1011_s25  }
  0x45   :  { %996 = dma.done.wait [#allocation3], 256  }
  0x46   :  { %997 = vsyncadd [#allocation3], 4294967040 }
  0x47   :  { %998 = dma.done.wait [#allocation6], 6144  }
  0x48   :  { %999 = vsyncadd [#allocation6], 4294961152 }
  0x49   :  { %1000 = dma.done.wait [#allocation9], 2048  }
  0x4a   :  { %1001 = vsyncadd [#allocation9], 4294965248  ;;  %v1012_v0 = vmov 0   ;;  %v794_v1 = vld [vmem:[#allocation5 + $0x4] ss:$8 sps:$4 sm:$0xff]   ;;  %v83_v26 = vld [vmem:[#allocation2] sm:$0xff]  ;;  %v104_v63 = vlaneseq }
  0x4b   :  { %226 = vmatprep.mubr.bf16.mxu0 %v1012_v0  ;;  %v796_v2 = vld [vmem:[#allocation5] ss:$8 sps:$4 sm:$0xff]   ;;  %194 = vmatprep.subr.bf16.mxu0 %v794_v1  ;;  %v797_v3 = vld [vmem:[#allocation5 + $0x14] ss:$8 sps:$4 sm:$0xff]   ;;  %v799_v4 = vld [vmem:[#allocation5 + $0x10] ss:$8 sps:$4 sm:$0xff]  }
  0x4c   :  { %195 = vmatpush1.bf16.msra.mxu0 %v796_v2  ;;  %v800_v5 = vld [vmem:[#allocation5 + $0x24] ss:$8 sps:$4 sm:$0xff]   ;;  %v802_v6 = vld [vmem:[#allocation5 + $0x20] ss:$8 sps:$4 sm:$0xff]   ;;  %v803_v7 = vld [vmem:[#allocation5 + $0x34] ss:$8 sps:$4 sm:$0xff]  }
  0x4d   :  { %196 = vmatprep.subr.bf16.mxu0 %v797_v3  ;;  %v805_v8 = vld [vmem:[#allocation5 + $0x30] ss:$8 sps:$4 sm:$0xff]   ;;  %v806_v9 = vld [vmem:[#allocation5 + $0x44] ss:$8 sps:$4 sm:$0xff]   ;;  %v820_v11 = vld [vmem:[#allocation7] ss:$8 sps:$4 sm:$0xff]  }
  0x4e   :  { %v818_v10 = vld [vmem:[#allocation7 + $0x4] ss:$8 sps:$4 sm:$0xff]   ;;  %v821_v12 = vld [vmem:[#allocation7 + $0x14] ss:$8 sps:$4 sm:$0xff]   ;;  %v808_v13 = vld [vmem:[#allocation5 + $0x40] ss:$8 sps:$4 sm:$0xff]  }
  0x4f   :  { %447 = vmatprep.subr.bf16.mxu1 %v818_v10  ;;  %v823_v14 = vld [vmem:[#allocation7 + $0x10] ss:$8 sps:$4 sm:$0xff]   ;;  %v809_v15 = vld [vmem:[#allocation5 + $0x54] ss:$8 sps:$4 sm:$0xff]   ;;  %v824_v16 = vld [vmem:[#allocation7 + $0x24] ss:$8 sps:$4 sm:$0xff]  }
  0x50   :  { %197 = vmatpush1.bf16.msra.mxu0 %v799_v4  ;;  %448 = vmatpush1.bf16.msra.mxu1 %v820_v11  ;;  %v811_v17 = vld [vmem:[#allocation5 + $0x50] ss:$8 sps:$4 sm:$0xff]   ;;  %v826_v18 = vld [vmem:[#allocation7 + $0x20] ss:$8 sps:$4 sm:$0xff]   ;;  %v812_v19 = vld [vmem:[#allocation5 + $0x64] ss:$8 sps:$4 sm:$0xff]  }
  0x51   :  { %198 = vmatprep.subr.bf16.mxu0 %v800_v5  ;;  %449 = vmatprep.subr.bf16.mxu1 %v821_v12  ;;  %v827_v20 = vld [vmem:[#allocation7 + $0x34] ss:$8 sps:$4 sm:$0xff]   ;;  %v814_v21 = vld [vmem:[#allocation5 + $0x60] ss:$8 sps:$4 sm:$0xff]   ;;  %v829_v22 = vld [vmem:[#allocation7 + $0x30] ss:$8 sps:$4 sm:$0xff]  }
  0x52   :  { %v815_v23 = vld [vmem:[#allocation5 + $0x74] ss:$8 sps:$4 sm:$0xff]   ;;  %v830_v24 = vld [vmem:[#allocation7 + $0x44] ss:$8 sps:$4 sm:$0xff]   ;;  %v817_v25 = vld [vmem:[#allocation5 + $0x70] ss:$8 sps:$4 sm:$0xff]  }
  0x53   :  { %v84_v27 = vld [vmem:[#allocation2 + $0x8] sm:$0xff]  ;;  %v832_v28 = vld [vmem:[#allocation7 + $0x40] ss:$8 sps:$4 sm:$0xff]   ;;  %v836_v32 = vld [vmem:[#allocation7 + $0x64] ss:$8 sps:$4 sm:$0xff]   ;;  %v105_v0 = vshrl.u32 %v104_v63, 7 }
  0x54   :  { %199 = vmatpush1.bf16.msra.mxu0 %v802_v6  ;;  %450 = vmatpush1.bf16.msra.mxu1 %v823_v14  ;;  %v833_v29 = vld [vmem:[#allocation7 + $0x54] ss:$8 sps:$4 sm:$0xff]   ;;  %v835_v30 = vld [vmem:[#allocation7 + $0x50] ss:$8 sps:$4 sm:$0xff]   ;;  %v85_v31 = vpack.c.bf16 %v84_v27, %v83_v26  ;;  %v838_v33 = vld [vmem:[#allocation7 + $0x60] ss:$8 sps:$4 sm:$0xff]  }
  0x55   :  { %200 = vmatprep.subr.bf16.mxu0 %v803_v7  ;;  %451 = vmatprep.subr.bf16.mxu1 %v824_v16  ;;  %v839_v34 = vld [vmem:[#allocation7 + $0x74] ss:$8 sps:$4 sm:$0xff]   ;;  %v841_v35 = vld [vmem:[#allocation7 + $0x70] ss:$8 sps:$4 sm:$0xff]   ;;  %v842_v36 = vld [vmem:[#allocation7 + $0x84] ss:$8 sps:$4 sm:$0xff]  }
  0x56   :  { %v844_v37 = vld [vmem:[#allocation7 + $0x80] ss:$8 sps:$4 sm:$0xff]   ;;  %v845_v38 = vld [vmem:[#allocation7 + $0x94] ss:$8 sps:$4 sm:$0xff]   ;;  %v847_v39 = vld [vmem:[#allocation7 + $0x90] ss:$8 sps:$4 sm:$0xff]  }
  0x57   :  { %v848_v40 = vld [vmem:[#allocation7 + $0xa4] ss:$8 sps:$4 sm:$0xff]   ;;  %v850_v41 = vld [vmem:[#allocation7 + $0xa0] ss:$8 sps:$4 sm:$0xff]   ;;  %v851_v42 = vld [vmem:[#allocation7 + $0xb4] ss:$8 sps:$4 sm:$0xff]  }
  0x58   :  { %201 = vmatpush1.bf16.msra.mxu0 %v805_v8  ;;  %452 = vmatpush1.bf16.msra.mxu1 %v826_v18  ;;  %v853_v43 = vld [vmem:[#allocation7 + $0xb0] ss:$8 sps:$4 sm:$0xff]   ;;  %v854_v44 = vld [vmem:[#allocation7 + $0xc4] ss:$8 sps:$4 sm:$0xff]   ;;  %v856_v45 = vld [vmem:[#allocation7 + $0xc0] ss:$8 sps:$4 sm:$0xff]  }
  0x59   :  { %202 = vmatprep.subr.bf16.mxu0 %v806_v9  ;;  %453 = vmatprep.subr.bf16.mxu1 %v827_v20  ;;  %v857_v46 = vld [vmem:[#allocation7 + $0xd4] ss:$8 sps:$4 sm:$0xff]   ;;  %v859_v47 = vld [vmem:[#allocation7 + $0xd0] ss:$8 sps:$4 sm:$0xff]   ;;  %v860_v48 = vld [vmem:[#allocation7 + $0xe4] ss:$8 sps:$4 sm:$0xff]  }
  0x5a   :  { %v862_v49 = vld [vmem:[#allocation7 + $0xe0] ss:$8 sps:$4 sm:$0xff]   ;;  %v863_v50 = vld [vmem:[#allocation7 + $0xf4] ss:$8 sps:$4 sm:$0xff]   ;;  %v865_v51 = vld [vmem:[#allocation7 + $0xf0] ss:$8 sps:$4 sm:$0xff]  }
  0x5b   :  { %v866_v52 = vld [vmem:[#allocation8 + $0x40] sm:$0xff]   ;;  %v868_v54 = vld [vmem:[#allocation8 + $0x48] sm:$0xff]   ;;  %v870_v56 = vld [vmem:[#allocation8 + $0x50] sm:$0xff]   ;;  %v106_v1 = vsub.s32 0, %v105_v0  ;;  %v110_v3 = vsub.s32 1, %v105_v0  ;;  %s1013_s9 = smov [#allocation10]  }
  0x5c   :  { %203 = vmatpush1.bf16.msra.mxu0 %v808_v13  ;;  %454 = vmatpush1.bf16.msra.mxu1 %v829_v22  ;;  %v867_v53 = vld [vmem:[#allocation8] sm:$0xff]   ;;  %v869_v55 = vld [vmem:[#allocation8 + $0x8] sm:$0xff]   ;;  %v871_v57 = vld [vmem:[#allocation8 + $0x10] sm:$0xff]   ;;  %s683_s10 = sshll.u32 %s1013_s9, 4  ;;  %s684_s10 = int_to_ptr.vmem [resolvable:$true] %s683_s10 }
  0x5d   :  { %204 = vmatprep.subr.bf16.mxu0 %v809_v15  ;;  %455 = vmatprep.subr.bf16.mxu1 %v830_v24  ;;  %v872_v58 = vld [vmem:[#allocation8 + $0x58] sm:$0xff]   ;;  %v874_v60 = vld [vmem:[#allocation8 + $0x60] sm:$0xff]   ;;  %v876_v62 = vld [vmem:[#allocation8 + $0x68] sm:$0xff]   ;;  %s974_s11 = scalar_lea.vmem %s684_s10, 256  ;;  %p979_p5 = scmp.lt.s32.totalorder %s684_s10, %s684_s10 }
  0x5e   :  { %v873_v59 = vld [vmem:[#allocation8 + $0x18] sm:$0xff]   ;;  %v875_v61 = vld [vmem:[#allocation8 + $0x20] sm:$0xff]   ;;  %v102_v2 = vld [vmem:[%s1151_s2] sm:$0x3]  ;;  %p975_p4 = scmp.ne.s32.totalorder %s684_s10, %s974_s11  ;;  %p980_p6 = scmp.lt.s32.totalorder %s974_s11, %s974_s11 }
  0x5f   :  { %v107_v4 = vrot.slane %v102_v2, %v106_v1  ;;  %v111_v5 = vrot.slane %v102_v2, %v110_v3  ;;  %v877_v20 = vld [vmem:[#allocation8 + $0x28] sm:$0xff]   ;;  %v879_v22 = vld [vmem:[#allocation8 + $0x30] sm:$0xff]   ;;  %v881_v24 = vld [vmem:[#allocation8 + $0x38] sm:$0xff]  }
  0x60   :  { %205 = vmatpush1.bf16.msra.mxu0 %v811_v17  ;;  %456 = vmatpush1.bf16.msra.mxu1 %v832_v28  ;;  %p981_p7 = por %p980_p6, %p979_p5 }
  0x61   :  { %206 = vmatprep.subr.bf16.mxu0 %v812_v19  ;;  %457 = vmatprep.subr.bf16.mxu1 %v833_v29 }
  0x62   :  { %p982_p8 = pnand %p981_p7, %p975_p4 }
  0x64   :  { %207 = vmatpush1.bf16.msra.mxu0 %v814_v21  ;;  %458 = vmatpush1.bf16.msra.mxu1 %v835_v30  ;;  %v878_v21 = vld [vmem:[#allocation8 + $0x70] sm:$0xff]  }
  0x65   :  { %208 = vmatprep.subr.bf16.mxu0 %v815_v23  ;;  %459 = vmatprep.subr.bf16.mxu1 %v836_v32  ;;  %v880_v23 = vld [vmem:[#allocation8 + $0x78] sm:$0xff]  }
  0x68   :  { %209 = vmatpush1.bf16.msra.mxu0 %v817_v25  ;;  %460 = vmatpush1.bf16.msra.mxu1 %v838_v33  ;;  %v275_v25 = vld [vmem:[%s1153_s4] sm:$0x3] }
  0x69   :  { %461 = vmatprep.subr.bf16.mxu1 %v839_v34  ;;  %762 = vmatprep.subr.bf16.mxu0 %v866_v52  ;;  %v280_v26 = vrot.slane %v275_v25, %v106_v1  ;;  %v284_v27 = vrot.slane %v275_v25, %v110_v3 }
  0x6b   :  { %227 = vmatmul.mubr.bf16.vlgmr.msra.gmra.mrb[0].mxu0 %v85_v31 }
  0x6c   :  { %462 = vmatpush1.bf16.msra.mxu1 %v841_v35  ;;  %763 = vmatpush3.bf16.msra.mxu0 %v867_v53 }
  0x6d   :  { %463 = vmatprep.subr.bf16.mxu1 %v842_v36  ;;  %764 = vmatprep.subr.bf16.mxu0 %v868_v54 }
  0x70   :  { %464 = vmatpush1.bf16.msra.mxu1 %v844_v37  ;;  %765 = vmatpush3.bf16.msra.mxu0 %v869_v55 }
  0x71   :  { %465 = vmatprep.subr.bf16.mxu1 %v845_v38  ;;  %766 = vmatprep.subr.bf16.mxu0 %v870_v56 }
  0x74   :  { %466 = vmatpush1.bf16.msra.mxu1 %v847_v39  ;;  %767 = vmatpush3.bf16.msra.mxu0 %v871_v57 }
  0x75   :  { %467 = vmatprep.subr.bf16.mxu1 %v848_v40  ;;  %768 = vmatprep.subr.bf16.mxu0 %v872_v58 }
  0x78   :  { %468 = vmatpush1.bf16.msra.mxu1 %v850_v41  ;;  %769 = vmatpush3.bf16.msra.mxu0 %v873_v59 }
  0x79   :  { %469 = vmatprep.subr.bf16.mxu1 %v851_v42  ;;  %770 = vmatprep.subr.bf16.mxu0 %v874_v60 }
  0x7c   :  { %470 = vmatpush1.bf16.msra.mxu1 %v853_v43  ;;  %771 = vmatpush3.bf16.msra.mxu0 %v875_v61  ;;  %v745_v43 = vld [vmem:[%s1155_s6] ss:$0 sm:$0xff] }
  0x7d   :  { %471 = vmatprep.subr.bf16.mxu1 %v854_v44  ;;  %772 = vmatprep.subr.bf16.mxu0 %v876_v62 }
  0x80   :  { %472 = vmatpush1.bf16.msra.mxu1 %v856_v45  ;;  %773 = vmatpush3.bf16.msra.mxu0 %v877_v20 }
  0x81   :  { %473 = vmatprep.subr.bf16.mxu1 %v857_v46  ;;  %774 = vmatprep.subr.bf16.mxu0 %v878_v21 }
  0x84   :  { %474 = vmatpush1.bf16.msra.mxu1 %v859_v47  ;;  %775 = vmatpush3.bf16.msra.mxu0 %v879_v22 }
  0x85   :  { %475 = vmatprep.subr.bf16.mxu1 %v860_v48  ;;  %776 = vmatprep.subr.bf16.mxu0 %v880_v23 }
  0x88   :  { %476 = vmatpush1.bf16.msra.mxu1 %v862_v49  ;;  %777 = vmatpush3.bf16.msra.mxu0 %v881_v24 }
  0x89   :  { %477 = vmatprep.subr.bf16.mxu1 %v863_v50 }
  0x8c   :  { %478 = vmatpush1.bf16.msra.mxu1 %v865_v51 }
 0x13e   :  { %v228_v6 = vpop.f32.mrb[0].mxu0 }
 0x13f   :  { %v229_v7 = vadd.f32 %v228_v6, %v107_v4  ;;  %v230_v8 = vpop.f32.mrb[1].mxu0 }
 0x140   :  { %v231_v9 = vadd.f32 %v230_v8, %v111_v5  ;;  %v232_v10 = vpop.f32.mrb[2].mxu0 }
 0x141   :  { %v233_v11 = vadd.f32 %v232_v10, %v107_v4  ;;  %v234_v12 = vpop.f32.mrb[3].mxu0  ;;  %v237_v14 = vmax.f32 %v229_v7, 0.0 }
 0x142   :  { %v235_v13 = vadd.f32 %v234_v12, %v111_v5  ;;  %v238_v16 = vmax.f32 %v231_v9, 0.0 }
 0x143   :  { %v239_v15 = vmax.f32 %v233_v11, 0.0 }
 0x144   :  { %v240_v17 = vmax.f32 %v235_v13, 0.0 }
 0x145   :  { %v241_v18 = vpack.c.bf16 %v239_v15, %v237_v14 }
 0x146   :  { %v242_v19 = vpack.c.bf16 %v240_v17, %v238_v16 }
 0x148   :  { %479 = vmatprep.mubr.bf16.mxu1 %v242_v19 }
 0x149   :  { %480 = vmatmul.mubr.bf16.vlgmr.msra.gmra.mrb[0].mxu1 %v241_v18 }
 0x21c   :  { %v481_v28 = vpop.f32.mrb[0].mxu1 }
 0x21d   :  { %v482_v29 = vadd.f32 %v481_v28, %v280_v26  ;;  %v483_v30 = vpop.f32.mrb[1].mxu1 }
 0x21e   :  { %v484_v31 = vadd.f32 %v483_v30, %v284_v27  ;;  %v485_v32 = vpop.f32.mrb[2].mxu1 }
 0x21f   :  { %v486_v33 = vadd.f32 %v485_v32, %v280_v26  ;;  %v487_v34 = vpop.f32.mrb[3].mxu1  ;;  %v490_v36 = vmax.f32 %v482_v29, 0.0 }
 0x220   :  { %v488_v35 = vadd.f32 %v487_v34, %v284_v27  ;;  %v491_v38 = vmax.f32 %v484_v31, 0.0 }
 0x221   :  { %v492_v37 = vmax.f32 %v486_v33, 0.0 }
 0x222   :  { %v493_v39 = vmax.f32 %v488_v35, 0.0 }
 0x223   :  { %v494_v40 = vpack.c.bf16 %v492_v37, %v490_v36 }
 0x224   :  { %v495_v41 = vpack.c.bf16 %v493_v39, %v491_v38 }
 0x226   :  { %663 = vmatprep.mubr.bf16.mxu0 %v495_v41 }
 0x227   :  { %664 = vmatmul.mubr.bf16.vlgmr.msra.gmra.mrb[4].mxu0 %v494_v40 }
 0x2fa   :  { %v778_v42 = vpop.f32.mrb[4].mxu0 }
 0x2fb   :  { %v779_v44 = vpop.f32.mrb[5].mxu0 }
 0x2fc   :  { %v780_v45 = vadd.f32 %v779_v44, %v778_v42  ;;  %v781_v46 = vpop.f32.mrb[6].mxu0 }
 0x2fd   :  { %v782_v47 = vpop.f32.mrb[7].mxu0 }
 0x2fe   :  { %v666_v48 = vadd.f32 %v780_v45, %v745_v43  ;;  %v783_v49 = vadd.f32 %v782_v47, %v781_v46 }
 0x300   :  { %882 = vtanh.f32 %v666_v48  ;;  %v669_v50 = vadd.f32 %v783_v49, %v745_v43 }
 0x302   :  { %884 = vtanh.f32 %v669_v50 }
 0x30a   :  { %v883_v51 = vpop.eup %882 }
 0x30b   :  { %v674_v52 = vmul.f32 5.0, %v883_v51 }
 0x30c   :  { %v885_v53 = vpop.eup %884 }
 0x30d   :  { %v675_v54 = vmul.f32 5.0, %v885_v53  ;;  %676 = vst [vmem:[#allocation10] sm:$0xff] %v674_v52 }
 0x30f   :  { %677 = vst [vmem:[#allocation10 + $0x8] sm:$0xff] %v675_v54 }
 0x310   :  { %985 = shalt.err (!%p982_p8)
}
 0x311   :  { %s986_s15 = scalar_lea.hbm %s1156_s7, 256 }
 0x312   :  { %p987_p9 = scmp.ne.s32.totalorder %s1156_s7, %s986_s15  ;;  %p990_p10 = scmp.lt.u32.totalorder %s986_s15, %s1156_s7 }
 0x314   :  { %p992_p11 = pnand %p990_p10, %p987_p9 }
 0x316   :  { %995 = shalt.err (!%p992_p11)
}
 0x317   :  { %689 = dma.vmem_to_hbm [thread:$0]  %s684_s10, 256, %s1156_s7, [#allocation4], %s1006_s13, %s1006_s13, %s1007_s14  }
 0x318   :  { %1002 = dma.done.wait [#allocation4], 256  }
 0x319   :  { %1003 = vsyncadd [#allocation4], 4294967040 }
 0x31a   :  { %693 = vsyncpa [#allocation3], 1 }
 0x31b   :  { %694 = vsyncpa [#allocation6], 1 }
 0x31c   :  { %695 = vsyncpa [#allocation9], 1 }
 0x31d   :  { %696 = vsyncpa [#allocation4], 1 }

</bundles_post_ra>
